<compile_context>
chip_gen: v5e
topology: v5e:2x2
jax: 0.10.0
libtpu: 0.0.40
codegen_flags: <defaults>
</compile_context>

<pallas_src>
import functools
import math

import numpy as np
import jax
import jax.numpy as jnp
from jax.experimental import pallas as pl
from jax.experimental.pallas import tpu as pltpu


# ---------------------------------------------------------------------------
# Deterministic wavelet filter (pywt 'haar'):  dec_lo / dec_hi, then reversed
# as done in IDWT_2D.__init__.
# ---------------------------------------------------------------------------
_SQRT2_INV = 1.0 / math.sqrt(2.0)
_DEC_LO = [_SQRT2_INV, _SQRT2_INV]
_DEC_HI = [-_SQRT2_INV, _SQRT2_INV]
BAND_LOW = list(reversed(_DEC_LO))    # [1/sqrt(2), 1/sqrt(2)]
BAND_HIGH = list(reversed(_DEC_HI))   # [1/sqrt(2), -1/sqrt(2)]


def _idwt_matrices(input_height, input_width, band_low, band_high):
    """Faithful port of IDWT_2D.get_matrix() (numpy, float32)."""
    band_length = len(band_low)
    assert band_length == len(band_high) and band_length % 2 == 0
    half = band_length // 2

    L1 = max(input_height, input_width)
    L = math.floor(L1 / 2)
    matrix_h = np.zeros((L, L1 + band_length - 2), dtype=np.float64)
    matrix_g = np.zeros((L1 - L, L1 + band_length - 2), dtype=np.float64)
    end = None if half == 1 else -half + 1

    index = 0
    for i in range(L):
        for j in range(band_length):
            matrix_h[i, index + j] = band_low[j]
        index += 2
    matrix_h_0 = matrix_h[0:math.floor(input_height / 2), 0:input_height + band_length - 2]
    matrix_h_1 = matrix_h[0:math.floor(input_width / 2), 0:input_width + band_length - 2]

    index = 0
    for i in range(L1 - L):
        for j in range(band_length):
            if index + j == matrix_g.shape[1]:
                continue
            matrix_g[i, index + j] = band_high[j]
        index += 2
    matrix_g_0 = matrix_g[0:input_height - math.floor(input_height / 2),
                          0:input_height + band_length - 2]
    matrix_g_1 = matrix_g[0:input_width - math.floor(input_width / 2),
                          0:input_width + band_length - 2]

    matrix_h_0 = matrix_h_0[:, half - 1:end]                 # (H/2, H)
    matrix_h_1 = np.transpose(matrix_h_1[:, half - 1:end])   # (W,   W/2)
    matrix_g_0 = matrix_g_0[:, half - 1:end]                 # (H/2, H)
    matrix_g_1 = np.transpose(matrix_g_1[:, half - 1:end])   # (W,   W/2)

    return (matrix_h_0.astype(np.float32), matrix_h_1.astype(np.float32),
            matrix_g_0.astype(np.float32), matrix_g_1.astype(np.float32))


# ---------------------------------------------------------------------------
# Pallas kernel: one grid step handles TB (n, c) slabs with 3 fused matmuls.
# ---------------------------------------------------------------------------
def _idwt2d_kernel(lh_ref, hl_ref, hh_ref, mh1t_ref, ml1t_ref, cat0t_ref,
                   out_ref, *, tb, h, H):
    """Refs:
       lh/hl/hh : (tb*h, w)   tb slabs stacked along the sublane axis
       mh1t/ml1t: (w, W)      pre-transposed row-transform matrices
       cat0t    : (H, 2h)     [matrix_low_0^T | matrix_high_0^T]
       out_ref  : (tb*H, W)
    """
    mh1t = mh1t_ref[...]
    ml1t = ml1t_ref[...]
    cat0t = cat0t_ref[...]
    n = tb * h

    # Row (width) transform — all tb slabs fused into one big M dimension.
    #   S[:n] = LH @ MH1^T ,  S[n:] = HH @ MH1^T   (per slab, row-blocked)
    stacked = jnp.concatenate([lh_ref[...], hh_ref[...]], axis=0)        # (2n, w)
    S = jnp.dot(stacked, mh1t, preferred_element_type=jnp.float32)       # (2n, W)
    L = S[:n]                                                            # (n, W)
    Hr = jnp.dot(hl_ref[...], ml1t, preferred_element_type=jnp.float32) + S[n:]

    # Column (height) transform — one fused (H, 2h) @ (2h, W) dot per slab.
    for s in range(tb):
        cat = jnp.concatenate([L[s * h:(s + 1) * h],
                               Hr[s * h:(s + 1) * h]], axis=0)           # (2h, W)
        out_ref[s * H:(s + 1) * H, :] = jnp.dot(
            cat0t, cat, preferred_element_type=jnp.float32).astype(out_ref.dtype)


def _pick_tb(B, h, H, W):
    """Largest slab-batch per grid step that fits a conservative VMEM budget
    (sized for v7x's 64 MiB physical VMEM; plenty of headroom on v5e/v6e)."""
    budget = 34 * 1024 * 1024                    # target working set, bytes
    mat_bytes = 8 * (H * H + W * W)              # resident matrices (double-buffered)
    per_slab = 22 * H * W + 256                  # pipelined blocks + temporaries / slab
    tb_cap = max(1, min(B, (budget - mat_bytes) // per_slab, 32))
    if B >= 2:
        # Keep >= 2 grid steps so both TensorCores get work on v7x megacore.
        tb_cap = min(tb_cap, max(1, B // 2))
    tb = 1
    for t in range(1, int(tb_cap) + 1):          # prefer sublane-aligned blocks
        if B % t == 0 and ((t * h) % 8 == 0 or t == B):
            tb = t
    if tb == 1:
        for t in range(1, int(tb_cap) + 1):      # fall back to any divisor of B
            if B % t == 0:
                tb = t
    return tb


def idwt_2d(LL, LH, HL, HH):
    """JAX/Pallas equivalent of IDWT_2D('haar').forward(LL, LH, HL, HH).

    Inputs: (N, C, H/2, W/2) each.  Output: (N, C, H, W) float32.
    (LL is accepted but unused, matching IDWTFunction_2D.forward exactly.)
    """
    assert LL.ndim == LH.ndim == HL.ndim == HH.ndim == 4
    N, C, h, w = LH.shape
    H = LL.shape[-2] + HH.shape[-2]
    W = LL.shape[-1] + HH.shape[-1]

    ml0, ml1, mh0, mh1 = _idwt_matrices(H, W, BAND_LOW, BAND_HIGH)
    mh1t = jnp.asarray(mh1.T)                                        # (w, W)
    ml1t = jnp.asarray(ml1.T)                                        # (w, W)
    cat0t = jnp.asarray(np.concatenate([ml0.T, mh0.T], axis=1))      # (H, 2h)

    B = N * C
    # Leading-dim merges of row-major arrays: free reshapes.
    lh2 = LH.reshape(B * h, w).astype(jnp.float32)
    hl2 = HL.reshape(B * h, w).astype(jnp.float32)
    hh2 = HH.reshape(B * h, w).astype(jnp.float32)

    tb = _pick_tb(B, h, H, W)
    grid = (B // tb,)

    band_spec = pl.BlockSpec((tb * h, w), lambda t: (t, 0))
    m1_spec = pl.BlockSpec((w, W), lambda t: (0, 0))
    m0_spec = pl.BlockSpec((H, 2 * h), lambda t: (0, 0))
    out_spec = pl.BlockSpec((tb * H, W), lambda t: (t, 0))

    flops = int(B * (1.5 * H * W * W + 2.0 * H * H * W))
    bytes_accessed = int(4 * (B * (3 * h * w + H * W) + 2 * w * W + 2 * H * h))

    kernel = functools.partial(_idwt2d_kernel, tb=tb, h=h, H=H)

    out = pl.pallas_call(
        kernel,
        out_shape=jax.ShapeDtypeStruct((B * H, W), jnp.float32),
        grid=grid,
        in_specs=[band_spec, band_spec, band_spec, m1_spec, m1_spec, m0_spec],
        out_specs=out_spec,
        compiler_params=pltpu.CompilerParams(
            dimension_semantics=("parallel",),
            vmem_limit_bytes=48 * 1024 * 1024),
        cost_estimate=pl.CostEstimate(
            flops=flops, transcendentals=0, bytes_accessed=bytes_accessed),
    )(lh2, hl2, hh2, mh1t, ml1t, cat0t)

    return out.reshape(N, C, H, W)     # leading-dim split: free


def _reference(LL, LH, HL, HH):
    """Plain-JAX reference mirroring IDWTFunction_2D.forward."""
    N, C, h, w = LL.shape
    H = h + HH.shape[-2]
    W = w + HH.shape[-1]
    ml0, ml1, mh0, mh1 = _idwt_matrices(H, W, BAND_LOW, BAND_HIGH)
    ml0, ml1, mh0, mh1 = map(jnp.asarray, (ml0, ml1, mh0, mh1))
    L = jnp.matmul(LH, mh1.T)
    Hh = jnp.matmul(HL, ml1.T) + jnp.matmul(HH, mh1.T)
    return jnp.matmul(ml0.T, L) + jnp.matmul(mh0.T, Hh)


if __name__ == "__main__":
    key = jax.random.PRNGKey(0)
    k1, k2, k3, k4 = jax.random.split(key, 4)
    N, C, H, W = 2, 4, 16, 16
    h, w = H // 2, W // 2
    LL = jax.random.normal(k1, (N, C, h, w), dtype=jnp.float32)
    LH = jax.random.normal(k2, (N, C, h, w), dtype=jnp.float32)
    HL = jax.random.normal(k3, (N, C, h, w), dtype=jnp.float32)
    HH = jax.random.normal(k4, (N, C, h, w), dtype=jnp.float32)

    out = idwt_2d(LL, LH, HL, HH)
    jax.block_until_ready(out)

    ref = _reference(LL, LH, HL, HH)
    assert out.shape == (N, C, H, W)
    assert jnp.allclose(out, ref, atol=1e-5, rtol=1e-5), "mismatch vs reference"
    print("KERNEL_OK")
</pallas_src>

<mosaic_0001>
module attributes {stable_mosaic.version = 11 : i64} {
  func.func @_idwt2d_kernel(%arg0: i32, %arg1: memref<32x8xf32, #tpu.memory_space<vmem>>, %arg2: memref<32x8xf32, #tpu.memory_space<vmem>>, %arg3: memref<32x8xf32, #tpu.memory_space<vmem>>, %arg4: memref<8x16xf32, #tpu.memory_space<vmem>>, %arg5: memref<8x16xf32, #tpu.memory_space<vmem>>, %arg6: memref<16x16xf32, #tpu.memory_space<vmem>>, %arg7: memref<64x16xf32, #tpu.memory_space<vmem>>) attributes {dimension_semantics = [#tpu.dimension_semantics<parallel>], iteration_bounds = array<i64: 2>, scalar_prefetch = 0 : i64, scratch_operands = 0 : i64, tpu.core_type = #tpu.core_type<tc>, window_params = [{transform_indices = @transform_0, window_bounds = array<i64: 32, 8>}, {transform_indices = @transform_1, window_bounds = array<i64: 32, 8>}, {transform_indices = @transform_2, window_bounds = array<i64: 32, 8>}, {pipeline_mode = #tpu.pipeline_mode<synchronous>, transform_indices = @transform_3, window_bounds = array<i64: 8, 16>}, {pipeline_mode = #tpu.pipeline_mode<synchronous>, transform_indices = @transform_4, window_bounds = array<i64: 8, 16>}, {pipeline_mode = #tpu.pipeline_mode<synchronous>, transform_indices = @transform_5, window_bounds = array<i64: 16, 16>}, {transform_indices = @transform_6, window_bounds = array<i64: 64, 16>}]} {
    %c0 = arith.constant 0 : index
    %c0_0 = arith.constant 0 : index
    %0 = vector.load %arg4[%c0, %c0_0] : memref<8x16xf32, #tpu.memory_space<vmem>>, vector<8x16xf32>
    %c0_1 = arith.constant 0 : index
    %c0_2 = arith.constant 0 : index
    %1 = vector.load %arg5[%c0_1, %c0_2] : memref<8x16xf32, #tpu.memory_space<vmem>>, vector<8x16xf32>
    %c0_3 = arith.constant 0 : index
    %c0_4 = arith.constant 0 : index
    %2 = vector.load %arg6[%c0_3, %c0_4] : memref<16x16xf32, #tpu.memory_space<vmem>>, vector<16x16xf32>
    %c0_5 = arith.constant 0 : index
    %c0_6 = arith.constant 0 : index
    %3 = vector.load %arg1[%c0_5, %c0_6] : memref<32x8xf32, #tpu.memory_space<vmem>>, vector<32x8xf32>
    %c0_7 = arith.constant 0 : index
    %c0_8 = arith.constant 0 : index
    %4 = vector.load %arg3[%c0_7, %c0_8] : memref<32x8xf32, #tpu.memory_space<vmem>>, vector<32x8xf32>
    %5 = tpu.concatenate %3, %4 in 0 : vector<32x8xf32>, vector<32x8xf32> -> vector<64x8xf32>
    %cst = arith.constant dense<0.000000e+00> : vector<64x16xf32>
    %6 = tpu.matmul %5, %0, %cst {dimension_numbers = #tpu.dot_dimension_numbers<[1], [0], [0], [1], [0, 0, 1, 1], [], []>} : vector<64x8xf32>, vector<8x16xf32>, vector<64x16xf32> -> vector<64x16xf32>
    %7 = vector.extract_strided_slice %6 {offsets = [0, 0], sizes = [32, 16], strides = [1, 1]} : vector<64x16xf32> to vector<32x16xf32>
    %c0_9 = arith.constant 0 : index
    %c0_10 = arith.constant 0 : index
    %8 = vector.load %arg2[%c0_9, %c0_10] : memref<32x8xf32, #tpu.memory_space<vmem>>, vector<32x8xf32>
    %cst_11 = arith.constant dense<0.000000e+00> : vector<32x16xf32>
    %9 = tpu.matmul %8, %1, %cst_11 {dimension_numbers = #tpu.dot_dimension_numbers<[1], [0], [0], [1], [0, 0, 1, 1], [], []>} : vector<32x8xf32>, vector<8x16xf32>, vector<32x16xf32> -> vector<32x16xf32>
    %10 = vector.extract_strided_slice %6 {offsets = [32, 0], sizes = [32, 16], strides = [1, 1]} : vector<64x16xf32> to vector<32x16xf32>
    %11 = arith.addf %9, %10 : vector<32x16xf32>
    %12 = vector.extract_strided_slice %7 {offsets = [0, 0], sizes = [8, 16], strides = [1, 1]} : vector<32x16xf32> to vector<8x16xf32>
    %13 = vector.extract_strided_slice %11 {offsets = [0, 0], sizes = [8, 16], strides = [1, 1]} : vector<32x16xf32> to vector<8x16xf32>
    %14 = tpu.concatenate %12, %13 in 0 : vector<8x16xf32>, vector<8x16xf32> -> vector<16x16xf32>
    %cst_12 = arith.constant dense<0.000000e+00> : vector<16x16xf32>
    %15 = tpu.matmul %2, %14, %cst_12 {dimension_numbers = #tpu.dot_dimension_numbers<[1], [0], [0], [1], [0, 0, 1, 1], [], []>} : vector<16x16xf32>, vector<16x16xf32>, vector<16x16xf32> -> vector<16x16xf32>
    %c0_13 = arith.constant 0 : index
    %c0_14 = arith.constant 0 : index
    %16 = vector.load %arg7[%c0_13, %c0_14] : memref<64x16xf32, #tpu.memory_space<vmem>>, vector<16x16xf32>
    tpu.vector_store %arg7[%c0_13, %c0_14], %15 {strides = array<i32>} : memref<64x16xf32, #tpu.memory_space<vmem>>, vector<16x16xf32>,
    %17 = vector.extract_strided_slice %7 {offsets = [8, 0], sizes = [8, 16], strides = [1, 1]} : vector<32x16xf32> to vector<8x16xf32>
    %18 = vector.extract_strided_slice %11 {offsets = [8, 0], sizes = [8, 16], strides = [1, 1]} : vector<32x16xf32> to vector<8x16xf32>
    %19 = tpu.concatenate %17, %18 in 0 : vector<8x16xf32>, vector<8x16xf32> -> vector<16x16xf32>
    %cst_15 = arith.constant dense<0.000000e+00> : vector<16x16xf32>
    %20 = tpu.matmul %2, %19, %cst_15 {dimension_numbers = #tpu.dot_dimension_numbers<[1], [0], [0], [1], [0, 0, 1, 1], [], []>} : vector<16x16xf32>, vector<16x16xf32>, vector<16x16xf32> -> vector<16x16xf32>
    %c16 = arith.constant 16 : index
    %c0_16 = arith.constant 0 : index
    %21 = vector.load %arg7[%c16, %c0_16] : memref<64x16xf32, #tpu.memory_space<vmem>>, vector<16x16xf32>
    tpu.vector_store %arg7[%c16, %c0_16], %20 {strides = array<i32>} : memref<64x16xf32, #tpu.memory_space<vmem>>, vector<16x16xf32>,
    %22 = vector.extract_strided_slice %7 {offsets = [16, 0], sizes = [8, 16], strides = [1, 1]} : vector<32x16xf32> to vector<8x16xf32>
    %23 = vector.extract_strided_slice %11 {offsets = [16, 0], sizes = [8, 16], strides = [1, 1]} : vector<32x16xf32> to vector<8x16xf32>
    %24 = tpu.concatenate %22, %23 in 0 : vector<8x16xf32>, vector<8x16xf32> -> vector<16x16xf32>
    %cst_17 = arith.constant dense<0.000000e+00> : vector<16x16xf32>
    %25 = tpu.matmul %2, %24, %cst_17 {dimension_numbers = #tpu.dot_dimension_numbers<[1], [0], [0], [1], [0, 0, 1, 1], [], []>} : vector<16x16xf32>, vector<16x16xf32>, vector<16x16xf32> -> vector<16x16xf32>
    %c32 = arith.constant 32 : index
    %c0_18 = arith.constant 0 : index
    %26 = vector.load %arg7[%c32, %c0_18] : memref<64x16xf32, #tpu.memory_space<vmem>>, vector<16x16xf32>
    tpu.vector_store %arg7[%c32, %c0_18], %25 {strides = array<i32>} : memref<64x16xf32, #tpu.memory_space<vmem>>, vector<16x16xf32>,
    %27 = vector.extract_strided_slice %7 {offsets = [24, 0], sizes = [8, 16], strides = [1, 1]} : vector<32x16xf32> to vector<8x16xf32>
    %28 = vector.extract_strided_slice %11 {offsets = [24, 0], sizes = [8, 16], strides = [1, 1]} : vector<32x16xf32> to vector<8x16xf32>
    %29 = tpu.concatenate %27, %28 in 0 : vector<8x16xf32>, vector<8x16xf32> -> vector<16x16xf32>
    %cst_19 = arith.constant dense<0.000000e+00> : vector<16x16xf32>
    %30 = tpu.matmul %2, %29, %cst_19 {dimension_numbers = #tpu.dot_dimension_numbers<[1], [0], [0], [1], [0, 0, 1, 1], [], []>} : vector<16x16xf32>, vector<16x16xf32>, vector<16x16xf32> -> vector<16x16xf32>
    %c48 = arith.constant 48 : index
    %c0_20 = arith.constant 0 : index
    %31 = vector.load %arg7[%c48, %c0_20] : memref<64x16xf32, #tpu.memory_space<vmem>>, vector<16x16xf32>
    tpu.vector_store %arg7[%c48, %c0_20], %30 {strides = array<i32>} : memref<64x16xf32, #tpu.memory_space<vmem>>, vector<16x16xf32>,
    return
  }
  func.func @transform_0(%arg0: i32) -> (i32, i32) {
    %c0_i32 = arith.constant 0 : i32
    %c0_i32_0 = arith.constant 0 : i32
    return %arg0, %c0_i32 : i32, i32
  }
  func.func @transform_1(%arg0: i32) -> (i32, i32) {
    %c0_i32 = arith.constant 0 : i32
    %c0_i32_0 = arith.constant 0 : i32
    return %arg0, %c0_i32 : i32, i32
  }
  func.func @transform_2(%arg0: i32) -> (i32, i32) {
    %c0_i32 = arith.constant 0 : i32
    %c0_i32_0 = arith.constant 0 : i32
    return %arg0, %c0_i32 : i32, i32
  }
  func.func @transform_3(%arg0: i32) -> (i32, i32) {
    %c0_i32 = arith.constant 0 : i32
    %c0_i32_0 = arith.constant 0 : i32
    %c0_i32_1 = arith.constant 0 : i32
    return %c0_i32, %c0_i32_0 : i32, i32
  }
  func.func @transform_4(%arg0: i32) -> (i32, i32) {
    %c0_i32 = arith.constant 0 : i32
    %c0_i32_0 = arith.constant 0 : i32
    %c0_i32_1 = arith.constant 0 : i32
    return %c0_i32, %c0_i32_0 : i32, i32
  }
  func.func @transform_5(%arg0: i32) -> (i32, i32) {
    %c0_i32 = arith.constant 0 : i32
    %c0_i32_0 = arith.constant 0 : i32
    %c0_i32_1 = arith.constant 0 : i32
    return %c0_i32, %c0_i32_0 : i32, i32
  }
  func.func @transform_6(%arg0: i32) -> (i32, i32) {
    %c0_i32 = arith.constant 0 : i32
    %c0_i32_0 = arith.constant 0 : i32
    return %arg0, %c0_i32 : i32, i32
  }
}

</mosaic_0001>

<bundles_post_ra>
// kernel: tpu_custom_call.1
= control target key start
LH: loop header
LB: loop body
LE: loop exit
PB: predicated region body
PF: predicated region fallthrough
CT: control target
= control target key end

     0   :  { %s698_s21 = smov 0   ;;  %s765_s0 = inlined_call_operand.vmem [shape: f32[64,8], index: 0, kind: input, shape index: {}]   ;;  %s766_s1 = inlined_call_operand.vmem [shape: f32[64,8], index: 1, kind: input, shape index: {}]   ;;  %s767_s2 = inlined_call_operand.vmem [shape: f32[64,8], index: 2, kind: input, shape index: {}]   ;;  %s768_s3 = inlined_call_operand.vmem [shape: f32[8,16], index: 3, kind: input, shape index: {}]   ;;  %s769_s4 = inlined_call_operand.vmem [shape: f32[8,16], index: 4, kind: input, shape index: {}]   ;;  %s770_s5 = inlined_call_operand.vmem [shape: f32[16,16], index: 5, kind: input, shape index: {}]   ;;  %s771_s6 = inlined_call_operand.vmem [shape: f32[128,16], index: 6, kind: output, shape index: {}]  }
   0x1 LB: > { %s609_s22 = sadd.s32 4294967295, %s661_s21   ;;  %p613_p0 = scmp.ge.s32.totalorder %s661_s21, 1  ;;  %s661_s21 = sphi %s698_s21, %s16_s21  }
   0x2   : > { %p235_p1 = scmp.lt.s32.totalorder %s661_s21, 3 }
   0x4   : > { %p236_p2 = pnand %p613_p0, %p235_p1 }
   0x5   : > { %s614_s25 = sshll.u32 (!%p236_p2), %s609_s22, 2  ;;  %s620_s18 = sshll.u32 (!%p236_p2), %s609_s22, 3 }
   0x6   : > { %239 = sbr.rel (%p236_p2) target bundleno = 335 (0x14f), region = 44  ;;  %p276_p3 = scmp.lt.s32.totalorder (!%p236_p2), %s614_s25, 7 }
   0x7   : > { %p294_p4 = scmp.lt.s32.totalorder (!%p236_p2), %s620_s18, 15 }
   0xb   : > { %v299_v0 = vld [vmem:[%s768_s3] sm:$0xff]  ;;  %s773_s25 = smov (!%p276_p3, %s614_s25), 7  ;;  %vm311_vm0 = vcmask 64512   ;;  %vm422_vm1 = vcmask 130048   ;;  %v302_v24 = vld [vmem:[%s770_s5 + $0x8] sm:$0xff]  ;;  %s775_s18 = smov (!%p294_p4, %s620_s18), 15 }
   0xc   : > { %v300_v1 = vld [vmem:[%s769_s4] sm:$0xff]  ;;  %351 = vmatpush.msra.mxu0 %v299_v0  ;;  %644 = vmatpush.msra.mxu1 %v299_v0  ;;  %s615_s28 = sshll.u32 %s773_s25, 3  ;;  %s621_s19 = sshll.u32 %s775_s18, 3 }
   0xd   : > { %645 = vmatpush.msra.mxu2 %v299_v0  ;;  %646 = vmatpush.msra.mxu3 %v299_v0  ;;  %s279_s7 = scalar_lea.vmem %s765_s0, %s615_s28  ;;  %s291_s10 = scalar_lea.vmem %s767_s2, %s615_s28  ;;  %v301_v21 = vld [vmem:[%s770_s5] sm:$0xff] }
   0xe   : > { %408 = vmatpush.msrb.mxu1 %v300_v1  ;;  %v303_v2 = vld [vmem:[%s279_s7] sm:$0xff]  ;;  %v308_v3 = vld [vmem:[%s291_s10 + $0x8] sm:$0xff]  ;;  %v309_v4 = vld [vmem:[%s291_s10 + $0x10] sm:$0xff]  ;;  %s285_s13 = scalar_lea.vmem %s766_s1, %s615_s28  ;;  %s297_s24 = scalar_lea.vmem %s771_s6, %s621_s19 }
   0xf   : > { %622 = vmatmul.msk.f32.vlgmr.msra.gmra.mxu0 %vm311_vm0, %v303_v2  ;;  %627 = vmatmul.msk.f32.vlgmr.msra.gmra.mxu1 %vm311_vm0, %v308_v3  ;;  %v310_v5 = vld [vmem:[%s291_s10 + $0x18] sm:$0xff]  ;;  %v304_v6 = vld [vmem:[%s279_s7 + $0x8] sm:$0xff]  ;;  %v377_v7 = vld [vmem:[%s285_s13] sm:$0xff] }
  0x10   : > { %628 = vmatmul.msk.f32.vlgmr.msra.gmra.mxu2 %vm311_vm0, %v309_v4  ;;  %629 = vmatmul.msk.f32.vlgmr.msra.gmra.mxu3 %vm311_vm0, %v310_v5  ;;  %v305_v8 = vld [vmem:[%s279_s7 + $0x10] sm:$0xff]  ;;  %v378_v9 = vld [vmem:[%s285_s13 + $0x8] sm:$0xff]  ;;  %v306_v10 = vld [vmem:[%s279_s7 + $0x18] sm:$0xff] }
  0x11   : > { %v379_v11 = vld [vmem:[%s285_s13 + $0x10] sm:$0xff]  ;;  %v307_v12 = vld [vmem:[%s291_s10] sm:$0xff]  ;;  %v380_v13 = vld [vmem:[%s285_s13 + $0x18] sm:$0xff] }
  0x17   : > { %623 = vmatmul.msk.f32.gmra.mxu0 %vm311_vm0, %v304_v6  ;;  %630 = vmatmul.msk.f32.vlgmr.msrb.gmra.mxu1 %vm311_vm0, %v377_v7 }
  0x1f   : > { %624 = vmatmul.msk.f32.gmra.mxu0 %vm311_vm0, %v305_v8  ;;  %631 = vmatmul.msk.f32.gmra.mxu1 %vm311_vm0, %v378_v9 }
  0x27   : > { %625 = vmatmul.msk.f32.gmra.mxu0 %vm311_vm0, %v306_v10  ;;  %632 = vmatmul.msk.f32.gmra.mxu1 %vm311_vm0, %v379_v11 }
  0x2f   : > { %626 = vmatmul.msk.f32.gmra.mxu0 %vm311_vm0, %v307_v12  ;;  %633 = vmatmul.msk.f32.gmra.mxu1 %vm311_vm0, %v380_v13 }
  0x8c   : > { %v353_v14 = vpop.f32.mrf.mxu0  ;;  %v368_v15 = vpop.f32.mrf.mxu1 }
  0x93   : > { %v374_v25 = vpop.f32.mrf.mxu3  ;;  %v371_v26 = vpop.f32.mrf.mxu2 }
  0x94   : > { %v356_v16 = vpop.f32.mrf.mxu0  ;;  %v410_v17 = vpop.f32.mrf.mxu1 }
  0x9c   : > { %v359_v18 = vpop.f32.mrf.mxu0  ;;  %v413_v19 = vpop.f32.mrf.mxu1 }
  0x9d   : > { %v414_v20 = vadd.f32 %v413_v19, %v368_v15 }
  0x9f   : > { %468 = vmatpush.msrb.mxu3 %v414_v20 }
  0xa1   : > { %469 = vmatpush.msrb.mxu3 %v356_v16 }
  0xa2   : > { %636 = vmatmul.msk.f32.vlgmr.msrb.gmra.mxu3 %vm422_vm1, %v301_v21 }
  0xa4   : > { %v362_v22 = vpop.f32.mrf.mxu0  ;;  %v416_v23 = vpop.f32.mrf.mxu1 }
  0xa5   : > { %v417_v31 = vadd.f32 %v416_v23, %v371_v26 }
  0xaa   : > { %637 = vmatmul.msk.f32.gmra.mxu3 %vm422_vm1, %v302_v24 }
  0xac   : > { %v365_v27 = vpop.f32.mrf.mxu0  ;;  %v419_v28 = vpop.f32.mrf.mxu1 }
  0xad   : > { %v411_v29 = vadd.f32 %v410_v17, %v365_v27  ;;  %v420_v30 = vadd.f32 %v419_v28, %v374_v25 }
  0xaf   : > { %443 = vmatpush.msrb.mxu2 %v411_v29  ;;  %518 = vmatpush.msra.mxu3 %v420_v30 }
  0xb1   : > { %444 = vmatpush.msrb.mxu2 %v353_v14  ;;  %519 = vmatpush.msra.mxu3 %v362_v22 }
  0xb2   : > { %640 = vmatmul.msk.f32.vlgmr.msra.gmra.mxu3 %vm422_vm1, %v301_v21  ;;  %634 = vmatmul.msk.f32.vlgmr.msrb.gmra.mxu2 %vm422_vm1, %v301_v21 }
  0xb3   : > { %493 = vmatpush.msra.mxu2 %v417_v31 }
  0xb5   : > { %494 = vmatpush.msra.mxu2 %v359_v18 }
  0xba   : > { %641 = vmatmul.msk.f32.gmra.mxu3 %vm422_vm1, %v302_v24  ;;  %635 = vmatmul.msk.f32.gmra.mxu2 %vm422_vm1, %v302_v24 }
  0xc2   : > { %638 = vmatmul.msk.f32.vlgmr.msra.gmra.mxu2 %vm422_vm1, %v301_v21 }
  0xca   : > { %639 = vmatmul.msk.f32.gmra.mxu2 %vm422_vm1, %v302_v24 }
 0x125   : > { %v471_v32 = vpop.f32.mrf.mxu3 }
 0x126   : > { %477 = vst.msk [vmem:[%s297_s24 + $0x10] sm:$0xff] %vm422_vm1, %v471_v32 }
 0x12d   : > { %v474_v33 = vpop.f32.mrf.mxu3 }
 0x12e   : > { %478 = vst.msk [vmem:[%s297_s24 + $0x18] sm:$0xff] %vm422_vm1, %v474_v33 }
 0x135   : > { %v521_v34 = vpop.f32.mrf.mxu3  ;;  %v446_v35 = vpop.f32.mrf.mxu2 }
 0x136   : > { %527 = vst.msk [vmem:[%s297_s24 + $0x30] sm:$0xff] %vm422_vm1, %v521_v34 }
 0x137   : > { %452 = vst.msk [vmem:[%s297_s24] sm:$0xff] %vm422_vm1, %v446_v35 }
 0x13d   : > { %v524_v36 = vpop.f32.mrf.mxu3  ;;  %v449_v37 = vpop.f32.mrf.mxu2 }
 0x13e   : > { %528 = vst.msk [vmem:[%s297_s24 + $0x38] sm:$0xff] %vm422_vm1, %v524_v36 }
 0x13f   : > { %453 = vst.msk [vmem:[%s297_s24 + $0x8] sm:$0xff] %vm422_vm1, %v449_v37 }
 0x145   : > { %v496_v38 = vpop.f32.mrf.mxu2 }
 0x146   : > { %502 = vst.msk [vmem:[%s297_s24 + $0x20] sm:$0xff] %vm422_vm1, %v496_v38 }
 0x14d   : > { %v499_v39 = vpop.f32.mrf.mxu2 }
 0x14e   : > { %503 = vst.msk [vmem:[%s297_s24 + $0x28] sm:$0xff] %vm422_vm1, %v499_v39 }
 0x14f PF: > { %s16_s21 = sadd.s32 1, %s661_s21  }
 0x150   : > { %p13_p5 = scmp.ge.s32.totalorder %s16_s21, 4  }
 0x152   :  { %15 = sbr.rel (!%p13_p5) target bundleno = 1 (0x1), region = 80 }

</bundles_post_ra>
